<compile_context>
chip_gen: v7x
topology: tpu7x:2x2x1
jax: 0.10.0
libtpu: 0.0.40
codegen_flags: <defaults>
</compile_context>

<pallas_src>
import functools

import jax
import jax.numpy as jnp
from jax.experimental import pallas as pl
from jax.experimental.pallas import tpu as pltpu


def _focal_kernel(x_ref, y_ref, loss_ref, sml1_ref, *,
                  alpha, gamma, eps, num_classes, s_total, tile_rows,
                  n_inner, mask_tail):
    # x_ref    : (1, C, TR, 128)  logits tile (source dtype; cast to f32 here)
    # y_ref    : (1, 1, TR, 128)  integer label tile
    # loss_ref : (1, 1, TR, 128)  per-pixel focal loss (written every step)
    # sml1_ref : (1, 1, TR, 128)  lane-dense SmoothL1 partial sums, resident
    #                             across the inner (reduction) grid axis
    k = pl.program_id(2)

    @pl.when(k == 0)
    def _():
        sml1_ref[...] = jnp.zeros_like(sml1_ref)

    def chan(ci):
        return x_ref[0, ci].astype(jnp.float32)          # (TR, 128)

    # Softmax over the channel axis, computed as C dense (TR, 128) planes:
    # plain VALU max/add over planes, no cross-sublane reductions.
    m = chan(0)
    for ci in range(1, num_classes):
        m = jnp.maximum(m, chan(ci))
    es = [jnp.exp(chan(ci) - m) for ci in range(num_classes)]   # EUP
    z = es[0]
    for ci in range(1, num_classes):
        z = z + es[ci]
    inv_z = 1.0 / z

    lab = y_ref[0, 0].astype(jnp.int32)                  # (TR, 128)

    loss_acc = None
    sml1_acc = None
    for ci in range(num_classes):
        p = es[ci] * inv_z + eps                         # softmax(x,1)[ci] + eps
        omp = 1.0 - p
        if gamma == 2.0:                                 # default: keep on VPU
            wt = omp * omp
        elif gamma == 1.0:
            wt = omp
        elif gamma == 0.0:
            wt = None
        else:
            wt = jnp.power(omp, gamma)                   # general gamma
        logp = jnp.log(p)
        fc = logp if wt is None else wt * logp           # (-alpha) applied later
        oh = (lab == ci).astype(jnp.float32) + 1e-6      # kornia one_hot eps
        term = oh * fc
        loss_acc = term if loss_acc is None else loss_acc + term

        # SmoothL1 (beta=1): p in [eps, 1+eps], onehot in {1e-6, 1+1e-6}
        # => |d| <= 1 always, so the Huber branch is exactly 0.5*d*d.
        d = p - oh
        hub = 0.5 * (d * d)
        sml1_acc = hub if sml1_acc is None else sml1_acc + hub

    # Per-pixel focal loss: scalar -alpha applied once after the channel sum.
    loss_ref[...] = ((-alpha) * loss_acc)[None, None]

    if mask_tail:
        # Zero out padded spatial positions so they don't contribute to the
        # SmoothL1 scalar reduction.
        row0 = (pl.program_id(1) * n_inner + k) * tile_rows
        rr = jax.lax.broadcasted_iota(jnp.int32, (tile_rows, 128), 0)
        ll = jax.lax.broadcasted_iota(jnp.int32, (tile_rows, 128), 1)
        pos = (row0 + rr) * 128 + ll
        sml1_acc = jnp.where(pos < s_total, sml1_acc, 0.0)
    sml1_ref[...] += sml1_acc[None, None]


def _cdiv(a, b):
    return -(-a // b)


def _round_up(v, m):
    return _cdiv(v, m) * m


@functools.partial(jax.jit,
                   static_argnames=("alpha", "gamma", "reduction", "eps",
                                    "tile_bytes"))
def focal_loss(x, y, alpha=0.25, gamma=2.0, reduction="none", eps=1e-6,
               tile_bytes=2 * 1024 * 1024):
    """x: (B, C, H, W) logits; y: (B, H, W) or (B, 1, H, W) integer labels."""
    b, c, h, w = x.shape
    s = h * w
    itemsize = jnp.dtype(x.dtype).itemsize

    # Lane-dense layout: spatial dim becomes (rows, 128) with rows on sublanes.
    r = _cdiv(s, 128)                                   # 128-lane rows needed
    # Spatial tile: ~tile_bytes of x per block, TR a multiple of 32 so f32 /
    # int16 / int8 blocks all land on native (·,128) tiles.
    tr = max(32, (tile_bytes // (c * 128 * itemsize)) // 32 * 32)
    tr = min(tr, _round_up(r, 32))
    num_blocks = _cdiv(r, tr)
    # Expose spatial parallelism for v7x megacore even when batch is 1 / odd.
    n_outer = 2 if num_blocks >= 2 else 1
    n_inner = _cdiv(num_blocks, n_outer)
    r_pad = n_outer * n_inner * tr
    s_pad = r_pad * 128

    x_flat = x.reshape(b, c, s)
    y_flat = y.reshape(b, s)
    if s_pad != s:
        # Zero-pad (finite softmax in padded lanes; masked out of sml1 and
        # sliced off the per-pixel output below).
        x_flat = jnp.pad(x_flat, ((0, 0), (0, 0), (0, s_pad - s)))
        y_flat = jnp.pad(y_flat, ((0, 0), (0, s_pad - s)))
    x4 = x_flat.reshape(b, c, r_pad, 128)
    # TODO(synk): sentinel/ignore labels (e.g. 255, -1) are not validated; they
    # would also break the original torch scatter_-based one_hot.
    label_dtype = jnp.int16 if c <= 32767 else jnp.int32
    y4 = y_flat.reshape(b, 1, r_pad, 128).astype(label_dtype)

    loss4, sml1_partial = pl.pallas_call(
        functools.partial(_focal_kernel, alpha=float(alpha), gamma=float(gamma),
                          eps=float(eps), num_classes=c, s_total=s,
                          tile_rows=tr, n_inner=n_inner,
                          mask_tail=(s_pad != s)),
        out_shape=(
            jax.ShapeDtypeStruct((b, 1, r_pad, 128), jnp.float32),   # per-pixel
            jax.ShapeDtypeStruct((b, n_outer, tr, 128), jnp.float32),  # sml1 partials
        ),
        grid_spec=pltpu.PrefetchScalarGridSpec(
            num_scalar_prefetch=0,
            grid=(b, n_outer, n_inner),                  # (par, par, reduce)
            in_specs=[
                pl.BlockSpec((1, c, tr, 128),
                             lambda i, j, k: (i, 0, j * n_inner + k, 0)),
                pl.BlockSpec((1, 1, tr, 128),
                             lambda i, j, k: (i, 0, j * n_inner + k, 0)),
            ],
            out_specs=[
                pl.BlockSpec((1, 1, tr, 128),
                             lambda i, j, k: (i, 0, j * n_inner + k, 0)),
                pl.BlockSpec((1, 1, tr, 128),
                             lambda i, j, k: (i, j, 0, 0)),
            ],
        ),
        compiler_params=pltpu.CompilerParams(
            dimension_semantics=("parallel", "parallel", "arbitrary"),
            vmem_limit_bytes=48 * 1024 * 1024,   # needed on v5e; < v7x 64 MiB
        ),
    )(x4, y4)

    # Tiny JAX epilogue (scalar glue + un-padding).
    sml1 = jnp.sum(sml1_partial) / (b * c * s)           # SmoothL1Loss 'mean'
    loss_map = loss4.reshape(b, s_pad)
    if s_pad != s:
        loss_map = loss_map[:, :s]
    loss_map = loss_map.reshape(b, h, w)
    if reduction == "none":
        loss = loss_map
    elif reduction == "mean":
        loss = jnp.mean(loss_map)
    elif reduction == "sum":
        loss = jnp.sum(loss_map)
    else:
        raise NotImplementedError(reduction)
    return loss + sml1


def _reference_focal_loss(x, y, alpha=0.25, gamma=2.0, reduction="none",
                          eps=1e-6):
    b, c, h, w = x.shape
    lab = y.reshape(b, h, w).astype(jnp.int32)
    p = jax.nn.softmax(x.astype(jnp.float32), axis=1) + eps
    onehot = jax.nn.one_hot(lab, c, axis=1, dtype=jnp.float32) + 1e-6
    d = p - onehot
    ad = jnp.abs(d)
    sml1 = jnp.mean(jnp.where(ad < 1.0, 0.5 * d * d, ad - 0.5))
    focal = -alpha * jnp.power(1.0 - p, gamma) * jnp.log(p)
    loss_tmp = jnp.sum(onehot * focal, axis=1)           # (B, H, W)
    if reduction == "none":
        loss = loss_tmp
    elif reduction == "mean":
        loss = jnp.mean(loss_tmp)
    else:
        loss = jnp.sum(loss_tmp)
    return loss + sml1


if __name__ == "__main__":
    key = jax.random.PRNGKey(0)
    kx, ky = jax.random.split(key)

    B, C, H, W = 2, 4, 16, 16
    x = jax.random.normal(kx, (B, C, H, W), dtype=jnp.float32)       # logits
    y = jax.random.randint(ky, (B, 1, H, W), 0, C, dtype=jnp.int32)  # labels

    out = jax.block_until_ready(focal_loss(x, y))
    ref = jax.block_until_ready(_reference_focal_loss(x, y))

    assert out.shape == (B, H, W), out.shape
    assert jnp.allclose(out, ref, rtol=1e-5, atol=1e-5), (
        float(jnp.max(jnp.abs(out - ref))))

    # TODO(synk): torch-style runtime type/shape validation (raising TypeError/
    # ValueError) is not replicated; only the numerical forward path is.
    print("KERNEL_OK")
</pallas_src>

<mosaic_0001>
module attributes {stable_mosaic.version = 11 : i64} {
  func.func @_focal_kernel(%arg0: i32, %arg1: i32, %arg2: i32, %arg3: memref<1x4x32x128xf32, #tpu.memory_space<vmem>>, %arg4: memref<1x1x32x128xi16, #tpu.memory_space<vmem>>, %arg5: memref<1x1x32x128xf32, #tpu.memory_space<vmem>>, %arg6: memref<1x1x32x128xf32, #tpu.memory_space<vmem>>) attributes {dimension_semantics = [#tpu.dimension_semantics<parallel>, #tpu.dimension_semantics<parallel>, #tpu.dimension_semantics<arbitrary>], iteration_bounds = array<i64: 2, 1, 1>, scalar_prefetch = 0 : i64, scratch_operands = 0 : i64, tpu.core_type = #tpu.core_type<tc>, window_params = [{transform_indices = @transform_0, window_bounds = array<i64: 1, 4, 32, 128>}, {transform_indices = @transform_1, window_bounds = array<i64: 1, 1, 32, 128>}, {transform_indices = @transform_2, window_bounds = array<i64: 1, 1, 32, 128>}, {transform_indices = @transform_3, window_bounds = array<i64: 1, 1, 32, 128>}]} {
    %c0_i32 = arith.constant 0 : i32
    %0 = arith.cmpi eq, %arg2, %c0_i32 : i32
    %1 = arith.extui %0 : i1 to i32
    %c0_i32_0 = arith.constant 0 : i32
    %2 = arith.cmpi ne, %1, %c0_i32_0 : i32
    scf.if %2 {
      %cst_65 = arith.constant 0.000000e+00 : f32
      %142 = vector.broadcast %cst_65 : f32 to vector<1x1x32x128xf32>
      %c0_66 = arith.constant 0 : index
      %c0_67 = arith.constant 0 : index
      %c0_68 = arith.constant 0 : index
      %c0_69 = arith.constant 0 : index
      %143 = vector.load %arg6[%c0_66, %c0_67, %c0_68, %c0_69] : memref<1x1x32x128xf32, #tpu.memory_space<vmem>>, vector<1x1x32x128xf32>
      tpu.vector_store %arg6[%c0_66, %c0_67, %c0_68, %c0_69], %142 {strides = array<i32>} : memref<1x1x32x128xf32, #tpu.memory_space<vmem>>, vector<1x1x32x128xf32>,
    } else {
    }
    %c0 = arith.constant 0 : index
    %c0_1 = arith.constant 0 : index
    %c0_2 = arith.constant 0 : index
    %c0_3 = arith.constant 0 : index
    %3 = vector.load %arg3[%c0, %c0_1, %c0_2, %c0_3] : memref<1x4x32x128xf32, #tpu.memory_space<vmem>>, vector<1x1x32x128xf32>
    %4 = vector.shape_cast %3 : vector<1x1x32x128xf32> to vector<32x128xf32>
    %c0_4 = arith.constant 0 : index
    %c1 = arith.constant 1 : index
    %c0_5 = arith.constant 0 : index
    %c0_6 = arith.constant 0 : index
    %5 = vector.load %arg3[%c0_4, %c1, %c0_5, %c0_6] : memref<1x4x32x128xf32, #tpu.memory_space<vmem>>, vector<1x1x32x128xf32>
    %6 = vector.shape_cast %5 : vector<1x1x32x128xf32> to vector<32x128xf32>
    %7 = arith.maximumf %4, %6 : vector<32x128xf32>
    %c0_7 = arith.constant 0 : index
    %c2 = arith.constant 2 : index
    %c0_8 = arith.constant 0 : index
    %c0_9 = arith.constant 0 : index
    %8 = vector.load %arg3[%c0_7, %c2, %c0_8, %c0_9] : memref<1x4x32x128xf32, #tpu.memory_space<vmem>>, vector<1x1x32x128xf32>
    %9 = vector.shape_cast %8 : vector<1x1x32x128xf32> to vector<32x128xf32>
    %10 = arith.maximumf %7, %9 : vector<32x128xf32>
    %c0_10 = arith.constant 0 : index
    %c3 = arith.constant 3 : index
    %c0_11 = arith.constant 0 : index
    %c0_12 = arith.constant 0 : index
    %11 = vector.load %arg3[%c0_10, %c3, %c0_11, %c0_12] : memref<1x4x32x128xf32, #tpu.memory_space<vmem>>, vector<1x1x32x128xf32>
    %12 = vector.shape_cast %11 : vector<1x1x32x128xf32> to vector<32x128xf32>
    %13 = arith.maximumf %10, %12 : vector<32x128xf32>
    %c0_13 = arith.constant 0 : index
    %c0_14 = arith.constant 0 : index
    %c0_15 = arith.constant 0 : index
    %c0_16 = arith.constant 0 : index
    %14 = vector.load %arg3[%c0_13, %c0_14, %c0_15, %c0_16] : memref<1x4x32x128xf32, #tpu.memory_space<vmem>>, vector<1x1x32x128xf32>
    %15 = vector.shape_cast %14 : vector<1x1x32x128xf32> to vector<32x128xf32>
    %16 = arith.subf %15, %13 : vector<32x128xf32>
    %17 = math.exp %16 : vector<32x128xf32>
    %c0_17 = arith.constant 0 : index
    %c1_18 = arith.constant 1 : index
    %c0_19 = arith.constant 0 : index
    %c0_20 = arith.constant 0 : index
    %18 = vector.load %arg3[%c0_17, %c1_18, %c0_19, %c0_20] : memref<1x4x32x128xf32, #tpu.memory_space<vmem>>, vector<1x1x32x128xf32>
    %19 = vector.shape_cast %18 : vector<1x1x32x128xf32> to vector<32x128xf32>
    %20 = arith.subf %19, %13 : vector<32x128xf32>
    %21 = math.exp %20 : vector<32x128xf32>
    %c0_21 = arith.constant 0 : index
    %c2_22 = arith.constant 2 : index
    %c0_23 = arith.constant 0 : index
    %c0_24 = arith.constant 0 : index
    %22 = vector.load %arg3[%c0_21, %c2_22, %c0_23, %c0_24] : memref<1x4x32x128xf32, #tpu.memory_space<vmem>>, vector<1x1x32x128xf32>
    %23 = vector.shape_cast %22 : vector<1x1x32x128xf32> to vector<32x128xf32>
    %24 = arith.subf %23, %13 : vector<32x128xf32>
    %25 = math.exp %24 : vector<32x128xf32>
    %c0_25 = arith.constant 0 : index
    %c3_26 = arith.constant 3 : index
    %c0_27 = arith.constant 0 : index
    %c0_28 = arith.constant 0 : index
    %26 = vector.load %arg3[%c0_25, %c3_26, %c0_27, %c0_28] : memref<1x4x32x128xf32, #tpu.memory_space<vmem>>, vector<1x1x32x128xf32>
    %27 = vector.shape_cast %26 : vector<1x1x32x128xf32> to vector<32x128xf32>
    %28 = arith.subf %27, %13 : vector<32x128xf32>
    %29 = math.exp %28 : vector<32x128xf32>
    %30 = arith.addf %17, %21 : vector<32x128xf32>
    %31 = arith.addf %30, %25 : vector<32x128xf32>
    %32 = arith.addf %31, %29 : vector<32x128xf32>
    %cst = arith.constant 1.000000e+00 : f32
    %33 = vector.broadcast %cst : f32 to vector<32x128xf32>
    %34 = arith.divf %33, %32 : vector<32x128xf32>
    %c0_29 = arith.constant 0 : index
    %c0_30 = arith.constant 0 : index
    %c0_31 = arith.constant 0 : index
    %c0_32 = arith.constant 0 : index
    %35 = vector.load %arg4[%c0_29, %c0_30, %c0_31, %c0_32] : memref<1x1x32x128xi16, #tpu.memory_space<vmem>>, vector<1x1x32x128xi16>
    %36 = vector.shape_cast %35 : vector<1x1x32x128xi16> to vector<32x128xi16>
    %37 = arith.extsi %36 : vector<32x128xi16> to vector<32x128xi32>
    %38 = arith.mulf %17, %34 : vector<32x128xf32>
    %cst_33 = arith.constant 9.99999997E-7 : f32
    %39 = vector.broadcast %cst_33 : f32 to vector<32x128xf32>
    %40 = arith.addf %38, %39 : vector<32x128xf32>
    %cst_34 = arith.constant 1.000000e+00 : f32
    %41 = vector.broadcast %cst_34 : f32 to vector<32x128xf32>
    %42 = arith.subf %41, %40 : vector<32x128xf32>
    %43 = arith.mulf %42, %42 : vector<32x128xf32>
    %44 = math.log %40 : vector<32x128xf32>
    %45 = arith.mulf %43, %44 : vector<32x128xf32>
    %c0_i32_35 = arith.constant 0 : i32
    %46 = vector.broadcast %c0_i32_35 : i32 to vector<32x128xi32>
    %47 = arith.cmpi eq, %37, %46 : vector<32x128xi32>
    %48 = arith.extui %47 : vector<32x128xi1> to vector<32x128xi32>
    %49 = arith.sitofp %48 : vector<32x128xi32> to vector<32x128xf32>
    %cst_36 = arith.constant 9.99999997E-7 : f32
    %50 = vector.broadcast %cst_36 : f32 to vector<32x128xf32>
    %51 = arith.addf %49, %50 : vector<32x128xf32>
    %52 = arith.mulf %51, %45 : vector<32x128xf32>
    %53 = arith.subf %40, %51 : vector<32x128xf32>
    %54 = arith.mulf %53, %53 : vector<32x128xf32>
    %cst_37 = arith.constant 5.000000e-01 : f32
    %55 = vector.broadcast %cst_37 : f32 to vector<32x128xf32>
    %56 = arith.mulf %55, %54 : vector<32x128xf32>
    %57 = arith.mulf %21, %34 : vector<32x128xf32>
    %cst_38 = arith.constant 9.99999997E-7 : f32
    %58 = vector.broadcast %cst_38 : f32 to vector<32x128xf32>
    %59 = arith.addf %57, %58 : vector<32x128xf32>
    %cst_39 = arith.constant 1.000000e+00 : f32
    %60 = vector.broadcast %cst_39 : f32 to vector<32x128xf32>
    %61 = arith.subf %60, %59 : vector<32x128xf32>
    %62 = arith.mulf %61, %61 : vector<32x128xf32>
    %63 = math.log %59 : vector<32x128xf32>
    %64 = arith.mulf %62, %63 : vector<32x128xf32>
    %c1_i32 = arith.constant 1 : i32
    %65 = vector.broadcast %c1_i32 : i32 to vector<32x128xi32>
    %66 = arith.cmpi eq, %37, %65 : vector<32x128xi32>
    %67 = arith.extui %66 : vector<32x128xi1> to vector<32x128xi32>
    %68 = arith.sitofp %67 : vector<32x128xi32> to vector<32x128xf32>
    %cst_40 = arith.constant 9.99999997E-7 : f32
    %69 = vector.broadcast %cst_40 : f32 to vector<32x128xf32>
    %70 = arith.addf %68, %69 : vector<32x128xf32>
    %71 = arith.mulf %70, %64 : vector<32x128xf32>
    %72 = arith.addf %52, %71 : vector<32x128xf32>
    %73 = arith.subf %59, %70 : vector<32x128xf32>
    %74 = arith.mulf %73, %73 : vector<32x128xf32>
    %cst_41 = arith.constant 5.000000e-01 : f32
    %75 = vector.broadcast %cst_41 : f32 to vector<32x128xf32>
    %76 = arith.mulf %75, %74 : vector<32x128xf32>
    %77 = arith.addf %56, %76 : vector<32x128xf32>
    %78 = arith.mulf %25, %34 : vector<32x128xf32>
    %cst_42 = arith.constant 9.99999997E-7 : f32
    %79 = vector.broadcast %cst_42 : f32 to vector<32x128xf32>
    %80 = arith.addf %78, %79 : vector<32x128xf32>
    %cst_43 = arith.constant 1.000000e+00 : f32
    %81 = vector.broadcast %cst_43 : f32 to vector<32x128xf32>
    %82 = arith.subf %81, %80 : vector<32x128xf32>
    %83 = arith.mulf %82, %82 : vector<32x128xf32>
    %84 = math.log %80 : vector<32x128xf32>
    %85 = arith.mulf %83, %84 : vector<32x128xf32>
    %c2_i32 = arith.constant 2 : i32
    %86 = vector.broadcast %c2_i32 : i32 to vector<32x128xi32>
    %87 = arith.cmpi eq, %37, %86 : vector<32x128xi32>
    %88 = arith.extui %87 : vector<32x128xi1> to vector<32x128xi32>
    %89 = arith.sitofp %88 : vector<32x128xi32> to vector<32x128xf32>
    %cst_44 = arith.constant 9.99999997E-7 : f32
    %90 = vector.broadcast %cst_44 : f32 to vector<32x128xf32>
    %91 = arith.addf %89, %90 : vector<32x128xf32>
    %92 = arith.mulf %91, %85 : vector<32x128xf32>
    %93 = arith.addf %72, %92 : vector<32x128xf32>
    %94 = arith.subf %80, %91 : vector<32x128xf32>
    %95 = arith.mulf %94, %94 : vector<32x128xf32>
    %cst_45 = arith.constant 5.000000e-01 : f32
    %96 = vector.broadcast %cst_45 : f32 to vector<32x128xf32>
    %97 = arith.mulf %96, %95 : vector<32x128xf32>
    %98 = arith.addf %77, %97 : vector<32x128xf32>
    %99 = arith.mulf %29, %34 : vector<32x128xf32>
    %cst_46 = arith.constant 9.99999997E-7 : f32
    %100 = vector.broadcast %cst_46 : f32 to vector<32x128xf32>
    %101 = arith.addf %99, %100 : vector<32x128xf32>
    %cst_47 = arith.constant 1.000000e+00 : f32
    %102 = vector.broadcast %cst_47 : f32 to vector<32x128xf32>
    %103 = arith.subf %102, %101 : vector<32x128xf32>
    %104 = arith.mulf %103, %103 : vector<32x128xf32>
    %105 = math.log %101 : vector<32x128xf32>
    %106 = arith.mulf %104, %105 : vector<32x128xf32>
    %c3_i32 = arith.constant 3 : i32
    %107 = vector.broadcast %c3_i32 : i32 to vector<32x128xi32>
    %108 = arith.cmpi eq, %37, %107 : vector<32x128xi32>
    %109 = arith.extui %108 : vector<32x128xi1> to vector<32x128xi32>
    %110 = arith.sitofp %109 : vector<32x128xi32> to vector<32x128xf32>
    %cst_48 = arith.constant 9.99999997E-7 : f32
    %111 = vector.broadcast %cst_48 : f32 to vector<32x128xf32>
    %112 = arith.addf %110, %111 : vector<32x128xf32>
    %113 = arith.mulf %112, %106 : vector<32x128xf32>
    %114 = arith.addf %93, %113 : vector<32x128xf32>
    %115 = arith.subf %101, %112 : vector<32x128xf32>
    %116 = arith.mulf %115, %115 : vector<32x128xf32>
    %cst_49 = arith.constant 5.000000e-01 : f32
    %117 = vector.broadcast %cst_49 : f32 to vector<32x128xf32>
    %118 = arith.mulf %117, %116 : vector<32x128xf32>
    %119 = arith.addf %98, %118 : vector<32x128xf32>
    %cst_50 = arith.constant -2.500000e-01 : f32
    %120 = vector.broadcast %cst_50 : f32 to vector<32x128xf32>
    %121 = arith.mulf %120, %114 : vector<32x128xf32>
    %122 = vector.shape_cast %121 : vector<32x128xf32> to vector<1x1x32x128xf32>
    %c0_51 = arith.constant 0 : index
    %c0_52 = arith.constant 0 : index
    %c0_53 = arith.constant 0 : index
    %c0_54 = arith.constant 0 : index
    %123 = vector.load %arg5[%c0_51, %c0_52, %c0_53, %c0_54] : memref<1x1x32x128xf32, #tpu.memory_space<vmem>>, vector<1x1x32x128xf32>
    tpu.vector_store %arg5[%c0_51, %c0_52, %c0_53, %c0_54], %122 {strides = array<i32>} : memref<1x1x32x128xf32, #tpu.memory_space<vmem>>, vector<1x1x32x128xf32>,
    %c1_i32_55 = arith.constant 1 : i32
    %124 = arith.muli %arg1, %c1_i32_55 : i32
    %125 = arith.addi %124, %arg2 : i32
    %c32_i32 = arith.constant 32 : i32
    %126 = arith.muli %125, %c32_i32 : i32
    %127 = tpu.iota {dimensions = array<i32: 0>} : vector<32x128xi32>
    %128 = tpu.iota {dimensions = array<i32: 1>} : vector<32x128xi32>
    %129 = vector.broadcast %126 : i32 to vector<32x128xi32>
    %130 = arith.addi %129, %127 : vector<32x128xi32>
    %c128_i32 = arith.constant 128 : i32
    %131 = vector.broadcast %c128_i32 : i32 to vector<32x128xi32>
    %132 = arith.muli %130, %131 : vector<32x128xi32>
    %133 = arith.addi %132, %128 : vector<32x128xi32>
    %c256_i32 = arith.constant 256 : i32
    %134 = vector.broadcast %c256_i32 : i32 to vector<32x128xi32>
    %135 = arith.cmpi slt, %133, %134 : vector<32x128xi32>
    %cst_56 = arith.constant 0.000000e+00 : f32
    %136 = vector.broadcast %cst_56 : f32 to vector<32x128xf32>
    %137 = arith.select %135, %119, %136 : vector<32x128xi1>, vector<32x128xf32>
    %c0_57 = arith.constant 0 : index
    %c0_58 = arith.constant 0 : index
    %c0_59 = arith.constant 0 : index
    %c0_60 = arith.constant 0 : index
    %138 = vector.load %arg6[%c0_57, %c0_58, %c0_59, %c0_60] : memref<1x1x32x128xf32, #tpu.memory_space<vmem>>, vector<1x1x32x128xf32>
    %139 = vector.shape_cast %137 : vector<32x128xf32> to vector<1x1x32x128xf32>
    %140 = arith.addf %138, %139 : vector<1x1x32x128xf32>
    %c0_61 = arith.constant 0 : index
    %c0_62 = arith.constant 0 : index
    %c0_63 = arith.constant 0 : index
    %c0_64 = arith.constant 0 : index
    %141 = vector.load %arg6[%c0_61, %c0_62, %c0_63, %c0_64] : memref<1x1x32x128xf32, #tpu.memory_space<vmem>>, vector<1x1x32x128xf32>
    tpu.vector_store %arg6[%c0_61, %c0_62, %c0_63, %c0_64], %140 {strides = array<i32>} : memref<1x1x32x128xf32, #tpu.memory_space<vmem>>, vector<1x1x32x128xf32>,
    return
  }
  func.func @transform_0(%arg0: i32, %arg1: i32, %arg2: i32) -> (i32, i32, i32, i32) {
    %c1_i32 = arith.constant 1 : i32
    %0 = arith.muli %arg1, %c1_i32 : i32
    %1 = arith.addi %0, %arg2 : i32
    %c0_i32 = arith.constant 0 : i32
    %c0_i32_0 = arith.constant 0 : i32
    %c0_i32_1 = arith.constant 0 : i32
    return %arg0, %c0_i32, %1, %c0_i32_0 : i32, i32, i32, i32
  }
  func.func @transform_1(%arg0: i32, %arg1: i32, %arg2: i32) -> (i32, i32, i32, i32) {
    %c1_i32 = arith.constant 1 : i32
    %0 = arith.muli %arg1, %c1_i32 : i32
    %1 = arith.addi %0, %arg2 : i32
    %c0_i32 = arith.constant 0 : i32
    %c0_i32_0 = arith.constant 0 : i32
    %c0_i32_1 = arith.constant 0 : i32
    return %arg0, %c0_i32, %1, %c0_i32_0 : i32, i32, i32, i32
  }
  func.func @transform_2(%arg0: i32, %arg1: i32, %arg2: i32) -> (i32, i32, i32, i32) {
    %c1_i32 = arith.constant 1 : i32
    %0 = arith.muli %arg1, %c1_i32 : i32
    %1 = arith.addi %0, %arg2 : i32
    %c0_i32 = arith.constant 0 : i32
    %c0_i32_0 = arith.constant 0 : i32
    %c0_i32_1 = arith.constant 0 : i32
    return %arg0, %c0_i32, %1, %c0_i32_0 : i32, i32, i32, i32
  }
  func.func @transform_3(%arg0: i32, %arg1: i32, %arg2: i32) -> (i32, i32, i32, i32) {
    %c0_i32 = arith.constant 0 : i32
    %c0_i32_0 = arith.constant 0 : i32
    %c0_i32_1 = arith.constant 0 : i32
    return %arg0, %arg1, %c0_i32, %c0_i32_0 : i32, i32, i32, i32
  }
}

</mosaic_0001>

<bundles_post_ra>
// kernel: focal_loss.1
= control target key start
LH: loop header
LB: loop body
LE: loop exit
PB: predicated region body
PF: predicated region fallthrough
CT: control target
= control target key end

     0   :  { %s1086_s12 = smov 0   ;;  %s1088_s13 = smov 0   ;;  %s1387_s0 = inlined_call_operand.vmem [shape: f32[2,4,32,128], index: 0, kind: input, shape index: {}]   ;;  %s1388_s1 = inlined_call_operand.vmem [shape: s16[2,1,32,128], index: 1, kind: input, shape index: {}]   ;;  %s1389_s2 = inlined_call_operand.vmem [shape: f32[2,1,32,128], index: 2, kind: output, shape index: {0}]   ;;  %s1390_s3 = inlined_call_operand.vmem [shape: f32[2,1,32,128], index: 3, kind: output, shape index: {1}]  }
   0x1   :  { %s1090_s14 = smov 0  }
   0x2 LB: > { %s33_s15 = sadd.s32 1, %s1059_s13  ;;  %p892_p0 = scmp.ge.s32.totalorder %s1063_s14, 1  ;;  %s1063_s14 = sphi %s1090_s14, %s14_s14   ;;  %s1059_s13 = sphi %s1088_s13, %s1392_s13   ;;  %s1055_s12 = sphi %s1086_s12, %s1391_s12  }
   0x3   : > { %p35_p1 = scmp.ge.s32.totalorder %s33_s15, 2  ;;  %p197_p2 = scmp.lt.s32.totalorder %s1063_s14, 3 }
   0x5   : > { %s1394_s15 = smov (%p35_p1, %s33_s15), 0  ;;  %p198_p3 = pnand %p892_p0, %p197_p2 }
   0x6   : > { %p252_p4 = scmp.lt.s32.totalorder (!%p198_p3), %s1055_s12, 1  ;;  %v684_v36 = vlaneseq (!%p198_p3) }
   0x7   : > { %201 = sbr.rel (%p198_p3) target bundleno = 130 (0x82), region = 28 }
   0x8   : > { %v1136_v43 = vshrl.u32 (!%p198_p3), %v684_v36, 7  ;;  %v1146_v57 = vand.u32 (!%p198_p3), 127, %v684_v36 }
   0xa   : > { %v696_v60 = vmul.u32 (!%p198_p3), 128, %v1136_v43  ;;  %v686_v61 = vadd.s32 (!%p198_p3), 8, %v1136_v43 }
   0xe   : > { %s1396_s12 = smov (!%p252_p4, %s1055_s12), 1 }
   0xf   : > { %s931_s16 = sshll.u32 %s1396_s12, 7  ;;  %s932_s20 = sshll.u32 %s1396_s12, 4 }
  0x10   : > { %s1110_s19 = scalar_lea.vmem %s1387_s0, %s931_s16  ;;  %s1127_s23 = scalar_lea.vmem %s1388_s1, %s932_s20 }
  0x11   : > { %v303_v0 = vld [vmem:[%s1110_s19] sm:$0xff]  ;;  %v304_v4 = vld [vmem:[%s1110_s19 + $0x8] sm:$0xff]  ;;  %v305_v13 = vld [vmem:[%s1110_s19 + $0x10] sm:$0xff]  ;;  %s933_s24 = sshll.u32 %s1396_s12, 5 }
  0x12   : > { %v901_v1 = vld [vmem:[%s1110_s19 + $0x20] sm:$0xff]  ;;  %v902_v5 = vld [vmem:[%s1110_s19 + $0x28] sm:$0xff]  ;;  %v903_v14 = vld [vmem:[%s1110_s19 + $0x30] sm:$0xff]  ;;  %s1308_s27 = scalar_lea.vmem %s1389_s2, %s933_s24  ;;  %s1334_s30 = scalar_lea.vmem %s1390_s3, %s933_s24 }
  0x13   : > { %v905_v2 = vld [vmem:[%s1110_s19 + $0x40] sm:$0xff]  ;;  %v312_v3 = vmax.f32 %v303_v0, %v901_v1  ;;  %v313_v7 = vmax.f32 %v304_v4, %v902_v5  ;;  %v906_v8 = vld [vmem:[%s1110_s19 + $0x48] sm:$0xff]  ;;  %v314_v23 = vmax.f32 %v305_v13, %v903_v14  ;;  %v907_v27 = vld [vmem:[%s1110_s19 + $0x50] sm:$0xff] }
  0x14   : > { %v909_v6 = vld [vmem:[%s1110_s19 + $0x60] sm:$0xff]  ;;  %v910_v12 = vld [vmem:[%s1110_s19 + $0x68] sm:$0xff]  ;;  %v911_v35 = vld [vmem:[%s1110_s19 + $0x70] sm:$0xff] }
  0x15   : > { %v321_v9 = vmax.f32 %v312_v3, %v905_v2  ;;  %v322_v10 = vmax.f32 %v313_v7, %v906_v8  ;;  %v323_v33 = vmax.f32 %v314_v23, %v907_v27  ;;  %v306_v37 = vld [vmem:[%s1110_s19 + $0x18] sm:$0xff]  ;;  %v936_v39 = vld [vmem:[%s1127_s23] sm:$0xff]  }
  0x16   : > { %v904_v38 = vld [vmem:[%s1110_s19 + $0x38] sm:$0xff]  ;;  %v937_v48 = vunpack.c.l.b16 %v936_v39 }
  0x17   : > { %v330_v11 = vmax.f32 %v321_v9, %v909_v6  ;;  %v331_v19 = vmax.f32 %v322_v10, %v910_v12  ;;  %v332_v40 = vmax.f32 %v323_v33, %v911_v35  ;;  %v315_v41 = vmax.f32 %v306_v37, %v904_v38  ;;  %v1134_v42 = vld [vmem:[%s1110_s19 + $0x58] sm:$0xff] }
  0x18   : > { %v1139_v49 = vld [vmem:[%s1110_s19 + $0x78] sm:$0xff]  ;;  %vm438_vm0 = vcmp.eq.s32.totalorder %v937_v48, 0  ;;  %vm498_vm1 = vcmp.eq.s32.totalorder %v937_v48, 1  ;;  %vm566_vm2 = vcmp.eq.s32.totalorder %v937_v48, 2  ;;  %v1173_v10 = vadd.s32 %v696_v60, %v1146_v57 }
  0x19   : > { %v334_v15 = vsub.f32 %v303_v0, %v330_v11  ;;  %v346_v16 = vsub.f32 %v901_v1, %v330_v11  ;;  %v358_v17 = vsub.f32 %v905_v2, %v330_v11  ;;  %v370_v18 = vsub.f32 %v909_v6, %v330_v11 }
  0x1a   : > { %v335_v25 = vsub.f32 %v304_v4, %v331_v19  ;;  %v347_v26 = vsub.f32 %v902_v5, %v331_v19  ;;  %v359_v28 = vsub.f32 %v906_v8, %v331_v19  ;;  %v371_v29 = vsub.f32 %v910_v12, %v331_v19 }
  0x1b   : > { %v338_v20 = vmul.f32 1.442695, %v334_v15  ;;  %v350_v21 = vmul.f32 1.442695, %v346_v16  ;;  %v362_v22 = vmul.f32 1.442695, %v358_v17  ;;  %v336_v44 = vsub.f32 %v305_v13, %v332_v40 }
  0x1c   : > { %v374_v24 = vmul.f32 1.442695, %v370_v18  ;;  %v340_v30 = vmul.f32 1.442695, %v335_v25  ;;  %v352_v31 = vmul.f32 1.442695, %v347_v26  ;;  %v348_v45 = vsub.f32 %v903_v14, %v332_v40 }
  0x1d   : > { %969 = vpow2.f32 %v338_v20  ;;  %v364_v32 = vmul.f32 1.442695, %v359_v28  ;;  %v376_v34 = vmul.f32 1.442695, %v371_v29  ;;  %v360_v46 = vsub.f32 %v907_v27, %v332_v40  ;;  %v943_v16 = vld [vmem:[%s1127_s23 + $0x8] sm:$0xff]  }
  0x1e   : > { %971 = vpow2.f32 %v350_v21  ;;  %v372_v47 = vsub.f32 %v911_v35, %v332_v40  ;;  %v342_v51 = vmul.f32 1.442695, %v336_v44  ;;  %v354_v52 = vmul.f32 1.442695, %v348_v45 }
  0x1f   : > { %973 = vpow2.f32 %v362_v22  ;;  %v366_v53 = vmul.f32 1.442695, %v360_v46  ;;  %v324_v54 = vmax.f32 %v315_v41, %v1134_v42  ;;  %v687_v0 = vadd.s32 16, %v1136_v43 }
  0x20   : > { %975 = vpow2.f32 %v374_v24  ;;  %v378_v56 = vmul.f32 1.442695, %v372_v47  ;;  %v938_v4 = vunpack.c.h.b16 %v936_v39  ;;  %v1065_v12 = vmov 0.0  }
  0x21   : > { %977 = vpow2.f32 %v340_v30  ;;  %v1157_v63 = vmax.f32 %v324_v54, %v1139_v49  ;;  %v913_v13 = vsel %vm438_vm0, 1.0, %v1065_v12  ;;  %v917_v14 = vsel %vm498_vm1, 1.0, %v1065_v12 }
  0x22   : > { %979 = vpow2.f32 %v352_v31  ;;  %v921_v15 = vsel %vm566_vm2, 1.0, %v1065_v12  ;;  %v697_v17 = vmul.u32 128, %v686_v61  ;;  %vm634_vm3 = vcmp.eq.s32.totalorder %v937_v48, 3 }
  0x23   : > { %981 = vpow2.f32 %v364_v32  ;;  %v337_v5 = vsub.f32 %v306_v37, %v1157_v63  ;;  %v349_v6 = vsub.f32 %v904_v38, %v1157_v63  ;;  %vm439_vm4 = vcmp.eq.s32.totalorder %v938_v4, 0 }
  0x24   : > { %983 = vpow2.f32 %v376_v34  ;;  %vm499_vm5 = vcmp.eq.s32.totalorder %v938_v4, 1  ;;  %v698_v21 = vmul.u32 128, %v687_v0  ;;  %v1183_v22 = vadd.f32 1e-06, %v913_v13 }
  0x25   : > { %985 = vpow2.f32 %v342_v51  ;;  %v344_v19 = vmul.f32 1.442695, %v337_v5  ;;  %v356_v20 = vmul.f32 1.442695, %v349_v6  ;;  %vm567_vm6 = vcmp.eq.s32.totalorder %v938_v4, 2 }
  0x26   : > { %987 = vpow2.f32 %v354_v52  ;;  %v941_v24 = vunpack.c.l.b16 %v943_v16  ;;  %v1186_v25 = vadd.f32 1e-06, %v917_v14  ;;  %v1188_v26 = vadd.f32 1e-06, %v921_v15 }
  0x27   : > { %v1141_v50 = vpop.eup %969  ;;  %989 = vpow2.f32 %v366_v53  ;;  %v925_v27 = vsel %vm634_vm3, 1.0, %v1065_v12  ;;  %v1192_v28 = vadd.s32 %v697_v17, %v1146_v57  ;;  %v914_v30 = vsel %vm439_vm4, 1.0, %v1065_v12 }
  0x28   : > { %v1144_v55 = vpop.eup %971  ;;  %991 = vpow2.f32 %v378_v56  ;;  %v918_v31 = vsel %vm499_vm5, 1.0, %v1065_v12  ;;  %v361_v32 = vsub.f32 %v1134_v42, %v1157_v63  ;;  %v922_v34 = vsel %vm567_vm6, 1.0, %v1065_v12 }
  0x29   : > { %v1148_v58 = vpop.eup %973  ;;  %v382_v59 = vadd.f32 %v1144_v55, %v1141_v50  ;;  %vm635_vm7 = vcmp.eq.s32.totalorder %v938_v4, 3  ;;  %v373_v35 = vsub.f32 %v1139_v49, %v1157_v63  ;;  %vm440_vm8 = vcmp.eq.s32.totalorder %v941_v24, 0 }
  0x2a   : > { %v1154_v62 = vpop.eup %975  ;;  %vm500_vm9 = vcmp.eq.s32.totalorder %v941_v24, 1  ;;  %v1211_v39 = vadd.f32 1e-06, %v925_v27  ;;  %v1213_v40 = vadd.f32 1e-06, %v914_v30  ;;  %vm568_vm10 = vcmp.eq.s32.totalorder %v941_v24, 2 }
  0x2b   : > { %v1160_v1 = vpop.eup %977  ;;  %v386_v2 = vadd.f32 %v1148_v58, %v382_v59  ;;  %v1216_v41 = vadd.s32 %v698_v21, %v1146_v57  ;;  %v1218_v42 = vadd.f32 1e-06, %v918_v31  ;;  %v1220_v44 = vadd.f32 1e-06, %v922_v34 }
  0x2c   : > { %v1163_v3 = vpop.eup %979  ;;  %v368_v46 = vmul.f32 1.442695, %v361_v32  ;;  %v926_v47 = vsel %vm635_vm7, 1.0, %v1065_v12  ;;  %v915_v48 = vsel %vm440_vm8, 1.0, %v1065_v12  ;;  %v919_v49 = vsel %vm500_vm9, 1.0, %v1065_v12 }
  0x2d   : > { %v1167_v7 = vpop.eup %981  ;;  %v390_v8 = vadd.f32 %v1154_v62, %v386_v2  ;;  %v383_v9 = vadd.f32 %v1163_v3, %v1160_v1  ;;  %v380_v51 = vmul.f32 1.442695, %v373_v35  ;;  %v923_v54 = vsel %vm568_vm10, 1.0, %v1065_v12 }
  0x2e   : > { %v1175_v11 = vpop.eup %983  ;;  %vm636_vm11 = vcmp.eq.s32.totalorder %v941_v24, 3  ;;  %v1229_v56 = vunpack.c.h.b16 %v943_v16  ;;  %v1235_v0 = vadd.f32 1e-06, %v926_v47  ;;  %v1237_v2 = vadd.f32 1e-06, %v915_v48 }
  0x2f   : > { %993 = vrcp.f32 %v390_v8  ;;  %v387_v18 = vadd.f32 %v1167_v7, %v383_v9  ;;  %v1194_v29 = vpop.eup %985  ;;  %v1239_v4 = vadd.f32 1e-06, %v919_v49  ;;  %vm704_vm13 = vcmp.lt.s32.totalorder %v1173_v10, 256 }
  0x30   : > { %995 = vpow2.f32 %v344_v19  ;;  %v1200_v33 = vpop.eup %987  ;;  %vm441_vm12 = vcmp.eq.s32.totalorder %v1229_v56, 0  ;;  %vm501_vm14 = vcmp.eq.s32.totalorder %v1229_v56, 1  ;;  %vm705_vm15 = vcmp.lt.s32.totalorder %v1192_v28, 256 }
  0x31   : > { %v391_v23 = vadd.f32 %v1175_v11, %v387_v18  ;;  %997 = vpow2.f32 %v356_v20  ;;  %v1205_v36 = vpop.eup %989  ;;  %v384_v37 = vadd.f32 %v1200_v33, %v1194_v29  ;;  %v1256_v21 = vsel %vm441_vm12, 1.0, %v1065_v12 }
  0x32   : > { %v1209_v38 = vpop.eup %991  ;;  %vm569_vm0 = vcmp.eq.s32.totalorder %v1229_v56, 2  ;;  %vm637_vm1 = vcmp.eq.s32.totalorder %v1229_v56, 3  ;;  %vm706_vm2 = vcmp.lt.s32.totalorder %v1216_v41, 256 }
  0x33   : > { %999 = vrcp.f32 %v391_v23  ;;  %v388_v45 = vadd.f32 %v1205_v36, %v384_v37  ;;  %v928_v28 = vsel %vm637_vm1, 1.0, %v1065_v12 }
  0x34   : > { %1001 = vpow2.f32 %v368_v46 }
  0x35   : > { %v392_v53 = vadd.f32 %v1209_v38, %v388_v45  ;;  %1003 = vpow2.f32 %v380_v51 }
  0x37   : > { %1005 = vrcp.f32 %v392_v53 }
  0x39   : > { %v994_v52 = vpop.eup %993 }
  0x3a   : > { %v410_v59 = vmul.f32 %v994_v52, %v1141_v50  ;;  %v470_v60 = vmul.f32 %v994_v52, %v1144_v55  ;;  %v538_v61 = vmul.f32 %v994_v52, %v1148_v58  ;;  %v606_v63 = vmul.f32 %v994_v52, %v1154_v62  ;;  %v1241_v9 = vpop.eup %995 }
  0x3b   : > { %v1243_v50 = vadd.f32 1e-06, %v923_v54  ;;  %v927_v55 = vsel %vm636_vm11, 1.0, %v1065_v12  ;;  %v1248_v58 = vpop.eup %997 }
  0x3c   : > { %v414_v5 = vadd.f32 1e-06, %v410_v59  ;;  %v474_v6 = vadd.f32 1e-06, %v470_v60  ;;  %v542_v8 = vadd.f32 1e-06, %v538_v61  ;;  %v385_v30 = vadd.f32 %v1248_v58, %v1241_v9 }
  0x3d   : > { %v610_v14 = vadd.f32 1e-06, %v606_v63  ;;  %v1000_v15 = vpop.eup %999  ;;  %v1253_v20 = vadd.f32 1e-06, %v927_v55 }
  0x3e   : > { %v418_v62 = vsub.f32 1.0, %v414_v5  ;;  %1007 = vlog2.f32 %v414_v5  ;;  %v458_v13 = vsub.f32 %v414_v5, %v1183_v22  ;;  %v478_v16 = vsub.f32 1.0, %v474_v6  ;;  %v1265_v52 = vpop.eup %1001 }
  0x3f   : > { %1009 = vlog2.f32 %v474_v6  ;;  %v522_v17 = vsub.f32 %v474_v6, %v1186_v25  ;;  %v590_v18 = vsub.f32 %v542_v8, %v1188_v26  ;;  %v546_v24 = vsub.f32 1.0, %v542_v8  ;;  %v1269_v61 = vpop.eup %1003 }
  0x40   : > { %v462_v19 = vmul.f32 %v458_v13, %v458_v13  ;;  %1011 = vlog2.f32 %v542_v8  ;;  %v614_v31 = vsub.f32 1.0, %v610_v14  ;;  %v658_v32 = vsub.f32 %v610_v14, %v1211_v39 }
  0x41   : > { %v526_v23 = vmul.f32 %v522_v17, %v522_v17  ;;  %v594_v27 = vmul.f32 %v590_v18, %v590_v18  ;;  %1013 = vlog2.f32 %v610_v14  ;;  %v411_v34 = vmul.f32 %v1000_v15, %v1160_v1  ;;  %v1272_v5 = vpop.eup %1005 }
  0x42   : > { %v422_v35 = vmul.f32 %v418_v62, %v418_v62  ;;  %v466_v37 = vmul.f32 0.5, %v462_v19  ;;  %v482_v45 = vmul.f32 %v478_v16, %v478_v16  ;;  %v471_v46 = vmul.f32 %v1000_v15, %v1163_v3 }
  0x43   : > { %v530_v47 = vmul.f32 0.5, %v526_v23  ;;  %v415_v48 = vadd.f32 1e-06, %v411_v34  ;;  %v539_v49 = vmul.f32 %v1000_v15, %v1167_v7  ;;  %v607_v51 = vmul.f32 %v1000_v15, %v1175_v11 }
  0x44   : > { %v550_v53 = vmul.f32 %v546_v24, %v546_v24  ;;  %v1267_v54 = vmul.f32 0.5, %v594_v27  ;;  %v662_v59 = vmul.f32 %v658_v32, %v658_v32  ;;  %v475_v60 = vadd.f32 1e-06, %v471_v46 }
  0x45   : > { %v618_v1 = vmul.f32 %v614_v31, %v614_v31  ;;  %v419_v63 = vsub.f32 1.0, %v415_v48  ;;  %1015 = vlog2.f32 %v415_v48  ;;  %v459_v3 = vsub.f32 %v415_v48, %v1213_v40 }
  0x46   : > { %v479_v6 = vsub.f32 1.0, %v475_v60  ;;  %1017 = vlog2.f32 %v475_v60  ;;  %v523_v7 = vsub.f32 %v475_v60, %v1218_v42  ;;  %v543_v11 = vadd.f32 1e-06, %v539_v49 }
  0x47   : > { %v463_v55 = vmul.f32 %v459_v3, %v459_v3  ;;  %v611_v62 = vadd.f32 1e-06, %v607_v51  ;;  %v1276_v13 = vadd.f32 %v1265_v52, %v385_v30  ;;  %v1278_v14 = vadd.f32 %v530_v47, %v466_v37 }
  0x48   : > { %v1008_v8 = vpop.eup %1007  ;;  %v1280_v17 = vmul.f32 0.5, %v662_v59  ;;  %v423_v18 = vmul.f32 %v419_v63, %v419_v63  ;;  %v527_v19 = vmul.f32 %v523_v7, %v523_v7  ;;  %1019 = vlog2.f32 %v543_v11 }
  0x49   : > { %v1010_v15 = vpop.eup %1009  ;;  %v427_v16 = vmul.f32 0.6931472, %v1008_v8  ;;  %v591_v27 = vsub.f32 %v543_v11, %v1220_v44  ;;  %v412_v31 = vmul.f32 %v1272_v5, %v1194_v29  ;;  %v483_v30 = vmul.f32 %v479_v6, %v479_v6 }
  0x4a   : > { %v1012_v23 = vpop.eup %1011  ;;  %v487_v24 = vmul.f32 0.6931472, %v1010_v15  ;;  %v547_v46 = vsub.f32 1.0, %v543_v11  ;;  %v1285_v48 = vmul.f32 0.5, %v463_v55  ;;  %v1287_v49 = vmul.f32 0.5, %v527_v19 }
  0x4b   : > { %v434_v32 = vmul.f32 %v427_v16, %v422_v35  ;;  %v555_v34 = vmul.f32 0.6931472, %v1012_v23  ;;  %v1014_v37 = vpop.eup %1013  ;;  %1021 = vlog2.f32 %v611_v62  ;;  %v659_v63 = vsub.f32 %v611_v62, %v1235_v0 }
  0x4c   : > { %v494_v47 = vmul.f32 %v487_v24, %v482_v45  ;;  %v623_v60 = vmul.f32 0.6931472, %v1014_v37  ;;  %v595_v29 = vmul.f32 %v591_v27, %v591_v27  ;;  %v615_v35 = vsub.f32 1.0, %v611_v62 }
  0x4d   : > { %v454_v51 = vmul.f32 %v1183_v22, %v434_v32  ;;  %v562_v59 = vmul.f32 %v555_v34, %v550_v53  ;;  %v416_v6 = vadd.f32 1e-06, %v412_v31  ;;  %v663_v11 = vmul.f32 %v659_v63, %v659_v63 }
  0x4e   : > { %v514_v3 = vmul.f32 %v1186_v25, %v494_v47  ;;  %v630_v45 = vmul.f32 %v623_v60, %v618_v1  ;;  %v472_v8 = vmul.f32 %v1272_v5, %v1200_v33  ;;  %v551_v22 = vmul.f32 %v547_v46, %v547_v46 }
  0x4f   : > { %v582_v7 = vmul.f32 %v1188_v26, %v562_v59  ;;  %v1016_v55 = vpop.eup %1015  ;;  %1023 = vlog2.f32 %v416_v6  ;;  %v460_v53 = vsub.f32 %v416_v6, %v1237_v2  ;;  %v420_v62 = vsub.f32 1.0, %v416_v6 }
  0x50   : > { %v518_v15 = vadd.f32 %v514_v3, %v454_v51  ;;  %v1018_v16 = vpop.eup %1017  ;;  %v650_v25 = vmul.f32 %v1211_v39, %v630_v45  ;;  %v429_v19 = vmul.f32 0.6931472, %v1016_v55  ;;  %v476_v23 = vadd.f32 1e-06, %v472_v8 }
  0x51   : > { %v489_v1 = vmul.f32 0.6931472, %v1018_v16  ;;  %v599_v24 = vmul.f32 0.5, %v595_v29  ;;  %v619_v27 = vmul.f32 %v615_v35, %v615_v35  ;;  %v667_v33 = vmul.f32 0.5, %v663_v11 }
  0x52   : > { %v586_v26 = vadd.f32 %v582_v7, %v518_v15  ;;  %v435_v31 = vmul.f32 %v429_v19, %v423_v18  ;;  %1025 = vlog2.f32 %v476_v23  ;;  %v524_v32 = vsub.f32 %v476_v23, %v1239_v4  ;;  %v1020_v34 = vpop.eup %1019 }
  0x53   : > { %v495_v37 = vmul.f32 %v489_v1, %v483_v30  ;;  %v464_v39 = vmul.f32 %v460_v53, %v460_v53  ;;  %v540_v47 = vmul.f32 %v1272_v5, %v1205_v36  ;;  %v557_v51 = vmul.f32 0.6931472, %v1020_v34 }
  0x54   : > { %v654_v46 = vadd.f32 %v650_v25, %v586_v26  ;;  %v455_v18 = vmul.f32 %v1213_v40, %v435_v31  ;;  %v424_v59 = vmul.f32 %v420_v62, %v420_v62  ;;  %v528_v60 = vmul.f32 %v524_v32, %v524_v32 }
  0x55   : > { %v1022_v63 = vpop.eup %1021  ;;  %v515_v3 = vmul.f32 %v1218_v42, %v495_v37  ;;  %v544_v29 = vadd.f32 1e-06, %v540_v47  ;;  %v608_v36 = vmul.f32 %v1272_v5, %v1209_v38  ;;  %v563_v35 = vmul.f32 %v557_v51, %v551_v22 }
  0x56   : > { %v674_v30 = vmul.f32 -0.25, %v654_v46  ;;  %v625_v6 = vmul.f32 0.6931472, %v1022_v63  ;;  %v480_v7 = vsub.f32 1.0, %v476_v23  ;;  %v393_v45 = vadd.f32 %v1269_v61, %v1276_v13 }
  0x57   : > { %v519_v40 = vadd.f32 %v515_v3, %v455_v18  ;;  %v468_v11 = vmul.f32 0.5, %v464_v39  ;;  %1027 = vlog2.f32 %v544_v29  ;;  %v592_v8 = vsub.f32 %v544_v29, %v1243_v50 }
  0x58   : > { %678 = vst [vmem:[%s1308_s27] sm:$0xff] %v674_v30  ;;  %v583_v38 = vmul.f32 %v1220_v44, %v563_v35  ;;  %v631_v42 = vmul.f32 %v625_v6, %v619_v27  ;;  %v612_v5 = vadd.f32 1e-06, %v608_v36  ;;  %1029 = vrcp.f32 %v393_v45 }
  0x59   : > { %v1024_v55 = vpop.eup %1023  ;;  %v532_v15 = vmul.f32 0.5, %v528_v60  ;;  %v596_v22 = vmul.f32 %v592_v8, %v592_v8  ;;  %v602_v13 = vadd.f32 %v1267_v54, %v1278_v14  ;;  %v535_v53 = vadd.f32 %v1287_v49, %v1285_v48 }
  0x5a   : > { %v587_v16 = vadd.f32 %v583_v38, %v519_v40  ;;  %v651_v25 = vmul.f32 %v1235_v0, %v631_v42  ;;  %v431_v19 = vmul.f32 0.6931472, %v1024_v55  ;;  %v484_v62 = vmul.f32 %v480_v7, %v480_v7 }
  0x5b   : > { %v600_v23 = vmul.f32 0.5, %v596_v22  ;;  %1031 = vlog2.f32 %v612_v5  ;;  %v660_v44 = vsub.f32 %v612_v5, %v1253_v20  ;;  %v670_v26 = vadd.f32 %v1280_v17, %v602_v13 }
  0x5c   : > { %v1026_v1 = vpop.eup %1025  ;;  %v655_v27 = vadd.f32 %v651_v25, %v587_v16  ;;  %v436_v31 = vmul.f32 %v431_v19, %v424_v59  ;;  %v548_v32 = vsub.f32 1.0, %v544_v29  ;;  %v603_v54 = vadd.f32 %v599_v24, %v535_v53 }
  0x5d   : > { %v491_v0 = vmul.f32 0.6931472, %v1026_v1  ;;  %v664_v14 = vmul.f32 %v660_v44, %v660_v44  ;;  %v708_v48 = vsel %vm704_vm13, %v670_v26, 0.0  ;;  %v536_v49 = vadd.f32 %v532_v15, %v468_v11 }
  0x5e   : > { %v675_v17 = vmul.f32 -0.25, %v655_v27  ;;  %v920_v34 = vsel %vm501_vm14, 1.0, %v1065_v12  ;;  %v671_v46 = vadd.f32 %v667_v33, %v603_v54  ;;  %v616_v37 = vsub.f32 1.0, %v612_v5  ;;  %720 = vst [vmem:[%s1334_s30] sm:$0xff] %v708_v48 }
  0x5f   : > { %v496_v24 = vmul.f32 %v491_v0, %v484_v62  ;;  %v668_v39 = vmul.f32 0.5, %v664_v14  ;;  %v604_v47 = vadd.f32 %v600_v23, %v536_v49  ;;  %v456_v18 = vmul.f32 %v1237_v2, %v436_v31 }
  0x60   : > { %679 = vst [vmem:[%s1308_s27 + $0x8] sm:$0xff] %v675_v17  ;;  %v552_v51 = vmul.f32 %v548_v32, %v548_v32  ;;  %v709_v10 = vsel %vm705_vm15, %v671_v46, 0.0  ;;  %v1349_v33 = vadd.f32 1e-06, %v1256_v21  ;;  %v1351_v29 = vadd.f32 1e-06, %v920_v34 }
  0x61   : > { %v1028_v59 = vpop.eup %1027  ;;  %v516_v60 = vmul.f32 %v1239_v4, %v496_v24  ;;  %v672_v63 = vadd.f32 %v668_v39, %v604_v47  ;;  %v924_v2 = vsel %vm569_vm0, 1.0, %v1065_v12  ;;  %v620_v36 = vmul.f32 %v616_v37, %v616_v37  ;;  %721 = vst [vmem:[%s1334_s30 + $0x8] sm:$0xff] %v709_v10 }
  0x62   : > { %v1030_v30 = vpop.eup %1029  ;;  %v559_v3 = vmul.f32 0.6931472, %v1028_v59  ;;  %v688_v12 = vadd.s32 24, %v1136_v43  ;;  %v581_v42 = vadd.f32 1e-06, %v924_v2 }
  0x63   : > { %v413_v35 = vmul.f32 %v1030_v30, %v1241_v9  ;;  %v473_v4 = vmul.f32 %v1030_v30, %v1248_v58  ;;  %v541_v21 = vmul.f32 %v1030_v30, %v1265_v52  ;;  %v520_v6 = vadd.f32 %v516_v60, %v456_v18 }
  0x64   : > { %v564_v7 = vmul.f32 %v559_v3, %v552_v51  ;;  %v609_v45 = vmul.f32 %v1030_v30, %v1269_v61  ;;  %v710_v40 = vsel %vm706_vm2, %v672_v63, 0.0  ;;  %v649_v55 = vadd.f32 1e-06, %v928_v28 }
  0x65   : > { %v1032_v11 = vpop.eup %1031  ;;  %v417_v8 = vadd.f32 1e-06, %v413_v35  ;;  %v477_v56 = vadd.f32 1e-06, %v473_v4  ;;  %v545_v58 = vadd.f32 1e-06, %v541_v21 }
  0x66   : > { %v584_v9 = vmul.f32 %v1243_v50, %v564_v7  ;;  %v627_v38 = vmul.f32 0.6931472, %v1032_v11  ;;  %v613_v5 = vadd.f32 1e-06, %v609_v45  ;;  %722 = vst [vmem:[%s1334_s30 + $0x10] sm:$0xff] %v710_v40  ;;  %v699_v13 = vmul.u32 128, %v688_v12 }
  0x67   : > { %1033 = vlog2.f32 %v417_v8  ;;  %v461_v52 = vsub.f32 %v417_v8, %v1349_v33  ;;  %v525_v41 = vsub.f32 %v477_v56, %v1351_v29  ;;  %v593_v50 = vsub.f32 %v545_v58, %v581_v42 }
  0x68   : > { %v588_v61 = vadd.f32 %v584_v9, %v520_v6  ;;  %v632_v15 = vmul.f32 %v627_v38, %v620_v36  ;;  %1035 = vlog2.f32 %v477_v56  ;;  %v421_v16 = vsub.f32 1.0, %v417_v8 }
  0x69   : > { %v465_v22 = vmul.f32 %v461_v52, %v461_v52  ;;  %v529_v53 = vmul.f32 %v525_v41, %v525_v41  ;;  %1037 = vlog2.f32 %v545_v58  ;;  %v597_v23 = vmul.f32 %v593_v50, %v593_v50 }
  0x6a   : > { %v652_v43 = vmul.f32 %v1253_v20, %v632_v15  ;;  %1039 = vlog2.f32 %v613_v5  ;;  %v661_v44 = vsub.f32 %v613_v5, %v649_v55  ;;  %v481_v26 = vsub.f32 1.0, %v477_v56 }
  0x6b   : > { %v469_v25 = vmul.f32 0.5, %v465_v22  ;;  %v533_v62 = vmul.f32 0.5, %v529_v53  ;;  %v703_v1 = vadd.s32 %v699_v13, %v1146_v57  ;;  %v601_v31 = vmul.f32 0.5, %v597_v23 }
  0x6c   : > { %v656_v19 = vadd.f32 %v652_v43, %v588_v61  ;;  %v665_v32 = vmul.f32 %v661_v44, %v661_v44  ;;  %v549_v0 = vsub.f32 1.0, %v545_v58  ;;  %v425_v20 = vmul.f32 %v421_v16, %v421_v16 }
  0x6d   : > { %v537_v54 = vadd.f32 %v533_v62, %v469_v25  ;;  %v617_v14 = vsub.f32 1.0, %v613_v5  ;;  %v485_v34 = vmul.f32 %v481_v26, %v481_v26  ;;  %vm707_vm3 = vcmp.lt.s32.totalorder %v703_v1, 256 }
  0x6e   : > { %v676_v27 = vmul.f32 -0.25, %v656_v19  ;;  %v669_v48 = vmul.f32 0.5, %v665_v32  ;;  %v553_v47 = vmul.f32 %v549_v0, %v549_v0 }
  0x6f   : > { %v605_v49 = vadd.f32 %v601_v31, %v537_v54  ;;  %v621_v51 = vmul.f32 %v617_v14, %v617_v14 }
  0x70   : > { %680 = vst [vmem:[%s1308_s27 + $0x10] sm:$0xff] %v676_v27 }
  0x71   : > { %v1034_v17 = vpop.eup %1033  ;;  %v673_v37 = vadd.f32 %v669_v48, %v605_v49 }
  0x72   : > { %v1036_v46 = vpop.eup %1035  ;;  %v433_v24 = vmul.f32 0.6931472, %v1034_v17 }
  0x73   : > { %v493_v39 = vmul.f32 0.6931472, %v1036_v46  ;;  %v1038_v57 = vpop.eup %1037  ;;  %v711_v10 = vsel %vm707_vm3, %v673_v37, 0.0 }
  0x74   : > { %v437_v18 = vmul.f32 %v433_v24, %v425_v20  ;;  %v1040_v59 = vpop.eup %1039  ;;  %v561_v63 = vmul.f32 0.6931472, %v1038_v57  ;;  %723 = vst [vmem:[%s1334_s30 + $0x18] sm:$0xff] %v711_v10 }
  0x75   : > { %v497_v60 = vmul.f32 %v493_v39, %v485_v34  ;;  %v629_v3 = vmul.f32 0.6931472, %v1040_v59 }
  0x76   : > { %v457_v30 = vmul.f32 %v1349_v33, %v437_v18  ;;  %v565_v28 = vmul.f32 %v561_v63, %v553_v47 }
  0x77   : > { %v517_v2 = vmul.f32 %v1351_v29, %v497_v60  ;;  %v633_v36 = vmul.f32 %v629_v3, %v621_v51 }
  0x78   : > { %v585_v4 = vmul.f32 %v581_v42, %v565_v28 }
  0x79   : > { %v521_v35 = vadd.f32 %v517_v2, %v457_v30  ;;  %v653_v21 = vmul.f32 %v649_v55, %v633_v36 }
  0x7b   : > { %v589_v6 = vadd.f32 %v585_v4, %v521_v35 }
  0x7d   : > { %v657_v7 = vadd.f32 %v653_v21, %v589_v6 }
  0x7f   : > { %v677_v45 = vmul.f32 -0.25, %v657_v7 }
  0x81   : > { %681 = vst [vmem:[%s1308_s27 + $0x18] sm:$0xff] %v677_v45 }
  0x82 PF: > { %s14_s14 = sadd.s32 1, %s1063_s14   ;;  %s1391_s12 = smov %s1059_s13 }
  0x83   : > { %p11_p5 = scmp.ge.s32.totalorder %s14_s14, 4   ;;  %s1392_s13 = smov %s1394_s15 }
  0x85   :  { %13 = sbr.rel (!%p11_p5) target bundleno = 2 (0x2), region = 80 }

</bundles_post_ra>
